<compile_context>
chip_gen: v7x
topology: tpu7x:2x2x1
jax: 0.10.0
libtpu: 0.0.40
codegen_flags: <defaults>
</compile_context>

<pallas_src>
import math

import jax
import jax.numpy as jnp
from jax.experimental import pallas as pl
from jax.experimental.pallas import tpu as pltpu

LRELU_SLOPE = 0.2
FUSED_SCALE = math.sqrt(2.0)


def _round_up(x, m):
    return ((x + m - 1) // m) * m


def residual_block_kernel(x_ref, w1_ref, b1_ref, w2_ref, b2_ref, o_ref):
    """One tile of rows: two EqualLinear(+fused_lrelu) layers + residual add.

    The sqrt(2) of the first fused_lrelu is pre-folded into w2 (see
    make_equal_linear_params), so only one sqrt(2) multiply remains here.
    """
    # EqualLinear 1: bf16 MXU matmul, f32 accumulate; bias + leaky-relu in f32.
    h = jnp.dot(x_ref[...].astype(jnp.bfloat16), w1_ref[...],
                preferred_element_type=jnp.float32)
    h = h + b1_ref[...]
    h = jnp.where(h >= 0.0, h, LRELU_SLOPE * h)          # sqrt(2) folded into W2

    # Dropout: identity in eval mode.
    # TODO(synk): training-mode dropout would use pltpu.prng_seed/prng_random_bits.

    # EqualLinear 2.
    o = jnp.dot(h.astype(jnp.bfloat16), w2_ref[...],
                preferred_element_type=jnp.float32)
    o = o + b2_ref[...]
    o = jnp.where(o >= 0.0, o, LRELU_SLOPE * o) * FUSED_SCALE

    # Residual add straight against the (already resident, f32) input tile,
    # then a single cast to the output dtype.
    o_ref[...] = (o + x_ref[...]).astype(o_ref.dtype)


def _num_tensorcores():
    """Best-effort TensorCores-per-chip: v7x has 2, v5e/v6e have 1."""
    try:
        kind = jax.devices()[0].device_kind.lower()
    except Exception:
        return 1
    return 2 if ("v7" in kind or "7x" in kind) else 1


def _choose_row_tile(n_rows, tm, num_tc):
    """Pick the row tile. Single-TC: one big block (or tm). Multi-TC (v7x):
    aim for an even number of grid steps >= 4 so both cores get balanced work."""
    if num_tc <= 1 or n_rows <= 32:
        # block_shape equal to the full dim is always legal, even if not a
        # multiple of 8, so a small batch runs as one un-split grid step.
        return n_rows if n_rows < tm else tm
    steps = pl.cdiv(n_rows, tm)
    steps = max(4, steps + (steps % 2))            # even, >= 4
    tile = max(8, _round_up(pl.cdiv(n_rows, steps), 8))
    return min(tm, tile)


def residual_block(x, w1t, b1, w2t, b2, *, tm=2048):
    """x: (N, D) f32.  w*t: (D, D) bf16, pre-scaled & transposed (w2t also
    carries the layer-1 sqrt(2)).  b*: (1, D) f32 (pre-scaled by lr_mul)."""
    N, D = x.shape
    assert tm % 8 == 0, "row tile must be a multiple of the 8-sublane tile"

    tm_eff = _choose_row_tile(N, tm, _num_tensorcores())
    grid = (pl.cdiv(N, tm_eff),)

    return pl.pallas_call(
        residual_block_kernel,
        out_shape=jax.ShapeDtypeStruct((N, D), x.dtype),
        grid_spec=pltpu.PrefetchScalarGridSpec(
            num_scalar_prefetch=0,
            grid=grid,
            in_specs=[
                # x rows tile (double-buffered by default; last block may be
                # partial — rows are independent and OOB stores are masked).
                pl.BlockSpec((tm_eff, D), lambda i: (i, 0)),
                # Resident operands: constant index_map -> single buffer.
                pl.BlockSpec((D, D), lambda i: (0, 0),
                             pipeline_mode=pl.Buffered(1)),   # W1^T (bf16)
                pl.BlockSpec((1, D), lambda i: (0, 0),
                             pipeline_mode=pl.Buffered(1)),   # b1 (f32)
                pl.BlockSpec((D, D), lambda i: (0, 0),
                             pipeline_mode=pl.Buffered(1)),   # sqrt(2)*W2^T (bf16)
                pl.BlockSpec((1, D), lambda i: (0, 0),
                             pipeline_mode=pl.Buffered(1)),   # b2 (f32)
            ],
            out_specs=pl.BlockSpec((tm_eff, D), lambda i: (i, 0)),
        ),
        compiler_params=pltpu.CompilerParams(
            dimension_semantics=("parallel",),
            # tm=2048, D=128: ~2 MiB x tiles + ~2 MiB out tiles (double
            # buffered) + 64 KiB resident bf16 weights + f32 intermediates —
            # well under 32 MiB on v5e/v6e/v7x alike.
            vmem_limit_bytes=32 * 1024 * 1024,
        ),
    )(x, w1t, b1, w2t, b2)


def make_equal_linear_params(wkey, latent_dim, lr_mul=0.01, bkey=None,
                             extra_weight_scale=1.0):
    """Mimics EqualLinear.__init__: weight = randn(out,in)/lr_mul, bias = 0
    (or random when bkey is given, to exercise the bias path in tests).
    Runtime scaling is folded into the stored params; `extra_weight_scale`
    lets the caller fold the previous layer's fused_lrelu sqrt(2) in."""
    weight = jax.random.normal(wkey, (latent_dim, latent_dim), jnp.float32) / lr_mul
    if bkey is None:
        bias = jnp.zeros((latent_dim,), jnp.float32)
    else:
        # Scaled up so bias*lr_mul is O(1) and a broken bias path is detectable.
        bias = jax.random.normal(bkey, (latent_dim,), jnp.float32) * 50.0
    scale = (1.0 / math.sqrt(latent_dim)) * lr_mul
    w_eff_t = (weight * scale * extra_weight_scale).T.astype(jnp.bfloat16)  # (in, out)
    b_eff = (bias * lr_mul).reshape(1, latent_dim)                          # f32 row
    return w_eff_t, b_eff


def reference_forward(x, w1t, b1, w2t, b2):
    """Pure-JAX reference with the identical bf16-operand / f32-accumulate
    recipe and the same sqrt(2)-folded-into-W2 formulation."""
    h = jnp.dot(x.astype(jnp.bfloat16), w1t, preferred_element_type=jnp.float32) + b1
    h = jnp.where(h >= 0.0, h, LRELU_SLOPE * h)
    o = jnp.dot(h.astype(jnp.bfloat16), w2t, preferred_element_type=jnp.float32) + b2
    o = jnp.where(o >= 0.0, o, LRELU_SLOPE * o) * FUSED_SCALE
    return o + x


if __name__ == "__main__":
    latent_dim = 128   # lane-aligned latent dim

    key = jax.random.PRNGKey(0)
    kx1, kx2, kw1, kw2, kb1, kb2 = jax.random.split(key, 6)

    w1t, b1 = make_equal_linear_params(kw1, latent_dim, bkey=kb1)
    w2t, b2 = make_equal_linear_params(kw2, latent_dim, bkey=kb2,
                                       extra_weight_scale=FUSED_SCALE)

    # Case 1: small batch -> single grid step on single-TC chips.
    x_small = jax.random.normal(kx1, (24, latent_dim), jnp.float32)
    out_small = jax.block_until_ready(residual_block(x_small, w1t, b1, w2t, b2))
    ref_small = reference_forward(x_small, w1t, b1, w2t, b2)
    assert out_small.shape == x_small.shape and out_small.dtype == x_small.dtype
    assert jnp.allclose(out_small, ref_small, atol=1e-2, rtol=1e-2), \
        "small-batch mismatch vs JAX reference"

    # Case 2: ragged batch with a small forced tile -> exercises the masked
    # partial last block (no wrapper-side padding or slicing).
    x_rag = jax.random.normal(kx2, (200, latent_dim), jnp.float32)
    out_rag = jax.block_until_ready(residual_block(x_rag, w1t, b1, w2t, b2, tm=64))
    ref_rag = reference_forward(x_rag, w1t, b1, w2t, b2)
    assert out_rag.shape == x_rag.shape and out_rag.dtype == x_rag.dtype
    assert jnp.allclose(out_rag, ref_rag, atol=1e-2, rtol=1e-2), \
        "ragged-batch mismatch vs JAX reference"

    print("KERNEL_OK")
</pallas_src>

<mosaic_0001>
module attributes {stable_mosaic.version = 11 : i64} {
  func.func @residual_block_kernel(%arg0: i32, %arg1: memref<24x128xf32, #tpu.memory_space<vmem>>, %arg2: memref<128x128xbf16, #tpu.memory_space<vmem>>, %arg3: memref<1x128xf32, #tpu.memory_space<vmem>>, %arg4: memref<128x128xbf16, #tpu.memory_space<vmem>>, %arg5: memref<1x128xf32, #tpu.memory_space<vmem>>, %arg6: memref<24x128xf32, #tpu.memory_space<vmem>>) attributes {dimension_semantics = [#tpu.dimension_semantics<parallel>], iteration_bounds = array<i64: 1>, scalar_prefetch = 0 : i64, scratch_operands = 0 : i64, tpu.core_type = #tpu.core_type<tc>, window_params = [{transform_indices = @transform_0, window_bounds = array<i64: 24, 128>}, {pipeline_mode = #tpu.pipeline_mode<synchronous>, transform_indices = @transform_1, window_bounds = array<i64: 128, 128>}, {pipeline_mode = #tpu.pipeline_mode<synchronous>, transform_indices = @transform_2, window_bounds = array<i64: 1, 128>}, {pipeline_mode = #tpu.pipeline_mode<synchronous>, transform_indices = @transform_3, window_bounds = array<i64: 128, 128>}, {pipeline_mode = #tpu.pipeline_mode<synchronous>, transform_indices = @transform_4, window_bounds = array<i64: 1, 128>}, {transform_indices = @transform_5, window_bounds = array<i64: 24, 128>}]} {
    %c0 = arith.constant 0 : index
    %c0_0 = arith.constant 0 : index
    %0 = vector.load %arg1[%c0, %c0_0] : memref<24x128xf32, #tpu.memory_space<vmem>>, vector<24x128xf32>
    %1 = arith.truncf %0 : vector<24x128xf32> to vector<24x128xbf16>
    %c0_1 = arith.constant 0 : index
    %c0_2 = arith.constant 0 : index
    %2 = vector.load %arg2[%c0_1, %c0_2] : memref<128x128xbf16, #tpu.memory_space<vmem>>, vector<128x128xbf16>
    %cst = arith.constant dense<0.000000e+00> : vector<24x128xf32>
    %3 = tpu.matmul %1, %2, %cst {dimension_numbers = #tpu.dot_dimension_numbers<[1], [0], [0], [1], [0, 0, 1, 1], [], []>} : vector<24x128xbf16>, vector<128x128xbf16>, vector<24x128xf32> -> vector<24x128xf32>
    %c0_3 = arith.constant 0 : index
    %c0_4 = arith.constant 0 : index
    %4 = vector.load %arg3[%c0_3, %c0_4] : memref<1x128xf32, #tpu.memory_space<vmem>>, vector<1x128xf32>
    %5 = vector.broadcast %4 : vector<1x128xf32> to vector<24x128xf32>
    %6 = arith.addf %3, %5 : vector<24x128xf32>
    %cst_5 = arith.constant 0.000000e+00 : f32
    %7 = vector.broadcast %cst_5 : f32 to vector<24x128xf32>
    %8 = arith.cmpf oge, %6, %7 : vector<24x128xf32>
    %cst_6 = arith.constant 2.000000e-01 : f32
    %9 = vector.broadcast %cst_6 : f32 to vector<24x128xf32>
    %10 = arith.mulf %9, %6 : vector<24x128xf32>
    %11 = arith.select %8, %6, %10 : vector<24x128xi1>, vector<24x128xf32>
    %12 = arith.truncf %11 : vector<24x128xf32> to vector<24x128xbf16>
    %c0_7 = arith.constant 0 : index
    %c0_8 = arith.constant 0 : index
    %13 = vector.load %arg4[%c0_7, %c0_8] : memref<128x128xbf16, #tpu.memory_space<vmem>>, vector<128x128xbf16>
    %cst_9 = arith.constant dense<0.000000e+00> : vector<24x128xf32>
    %14 = tpu.matmul %12, %13, %cst_9 {dimension_numbers = #tpu.dot_dimension_numbers<[1], [0], [0], [1], [0, 0, 1, 1], [], []>} : vector<24x128xbf16>, vector<128x128xbf16>, vector<24x128xf32> -> vector<24x128xf32>
    %c0_10 = arith.constant 0 : index
    %c0_11 = arith.constant 0 : index
    %15 = vector.load %arg5[%c0_10, %c0_11] : memref<1x128xf32, #tpu.memory_space<vmem>>, vector<1x128xf32>
    %16 = vector.broadcast %15 : vector<1x128xf32> to vector<24x128xf32>
    %17 = arith.addf %14, %16 : vector<24x128xf32>
    %cst_12 = arith.constant 0.000000e+00 : f32
    %18 = vector.broadcast %cst_12 : f32 to vector<24x128xf32>
    %19 = arith.cmpf oge, %17, %18 : vector<24x128xf32>
    %cst_13 = arith.constant 2.000000e-01 : f32
    %20 = vector.broadcast %cst_13 : f32 to vector<24x128xf32>
    %21 = arith.mulf %20, %17 : vector<24x128xf32>
    %22 = arith.select %19, %17, %21 : vector<24x128xi1>, vector<24x128xf32>
    %cst_14 = arith.constant 1.41421354 : f32
    %23 = vector.broadcast %cst_14 : f32 to vector<24x128xf32>
    %24 = arith.mulf %22, %23 : vector<24x128xf32>
    %c0_15 = arith.constant 0 : index
    %c0_16 = arith.constant 0 : index
    %25 = vector.load %arg1[%c0_15, %c0_16] : memref<24x128xf32, #tpu.memory_space<vmem>>, vector<24x128xf32>
    %26 = arith.addf %24, %25 : vector<24x128xf32>
    %c0_17 = arith.constant 0 : index
    %c0_18 = arith.constant 0 : index
    %27 = vector.load %arg6[%c0_17, %c0_18] : memref<24x128xf32, #tpu.memory_space<vmem>>, vector<24x128xf32>
    tpu.vector_store %arg6[%c0_17, %c0_18], %26 {strides = array<i32>} : memref<24x128xf32, #tpu.memory_space<vmem>>, vector<24x128xf32>,
    return
  }
  func.func @transform_0(%arg0: i32) -> (i32, i32) {
    %c0_i32 = arith.constant 0 : i32
    %c0_i32_0 = arith.constant 0 : i32
    return %arg0, %c0_i32 : i32, i32
  }
  func.func @transform_1(%arg0: i32) -> (i32, i32) {
    %c0_i32 = arith.constant 0 : i32
    %c0_i32_0 = arith.constant 0 : i32
    %c0_i32_1 = arith.constant 0 : i32
    return %c0_i32, %c0_i32_0 : i32, i32
  }
  func.func @transform_2(%arg0: i32) -> (i32, i32) {
    %c0_i32 = arith.constant 0 : i32
    %c0_i32_0 = arith.constant 0 : i32
    %c0_i32_1 = arith.constant 0 : i32
    return %c0_i32, %c0_i32_0 : i32, i32
  }
  func.func @transform_3(%arg0: i32) -> (i32, i32) {
    %c0_i32 = arith.constant 0 : i32
    %c0_i32_0 = arith.constant 0 : i32
    %c0_i32_1 = arith.constant 0 : i32
    return %c0_i32, %c0_i32_0 : i32, i32
  }
  func.func @transform_4(%arg0: i32) -> (i32, i32) {
    %c0_i32 = arith.constant 0 : i32
    %c0_i32_0 = arith.constant 0 : i32
    %c0_i32_1 = arith.constant 0 : i32
    return %c0_i32, %c0_i32_0 : i32, i32
  }
  func.func @transform_5(%arg0: i32) -> (i32, i32) {
    %c0_i32 = arith.constant 0 : i32
    %c0_i32_0 = arith.constant 0 : i32
    return %arg0, %c0_i32 : i32, i32
  }
}

</mosaic_0001>

<bundles_post_ra>
// kernel: tpu_custom_call.1
= control target key start
LH: loop header
LB: loop body
LE: loop exit
PB: predicated region body
PF: predicated region fallthrough
CT: control target
= control target key end

     0   :  { %10 = vsyncpa [#allocation3], 0  ;;  %s661_s0 = inlined_call_operand.hbm [shape: f32[24,128], index: 0, kind: input, shape index: {}]   ;;  %s662_s1 = inlined_call_operand.hbm [shape: bf16[128,128], index: 1, kind: input, shape index: {}]   ;;  %s663_s2 = inlined_call_operand.vmem [shape: f32[1,128], index: 2, kind: input, shape index: {}]   ;;  %s664_s3 = inlined_call_operand.hbm [shape: bf16[128,128], index: 3, kind: input, shape index: {}]   ;;  %s665_s4 = inlined_call_operand.vmem [shape: f32[1,128], index: 4, kind: input, shape index: {}]   ;;  %s666_s5 = inlined_call_operand.hbm [shape: f32[24,128], index: 5, kind: output, shape index: {}]  }
   0x1   :  { %11 = vsyncpa [#allocation6], 0 }
   0x2   :  { %12 = vsyncpa [#allocation4], 0  ;;  %s549_s18 = smov [#allocation5]   ;;  %s455_s22 = scalar_lea.hbm %s662_s1, 1024 }
   0x3   :  { %s30_s19 = sshll.u32 %s549_s18, 4  ;;  %p456_p0 = scmp.ne.s32.totalorder %s662_s1, %s455_s22  ;;  %s31_s19 = int_to_ptr.vmem [resolvable:$true] %s30_s19 }
   0x4   :  { %p459_p1 = scmp.lt.u32.totalorder %s455_s22, %s662_s1 }
   0x6   :  { %p461_p2 = pnand %p459_p1, %p456_p0 }
   0x8   :  { %464 = shalt.err (!%p461_p2)
}
   0x9   :  { %s465_s27 = scalar_lea.vmem %s31_s19, 1024  ;;  %p470_p4 = scmp.lt.s32.totalorder %s31_s19, %s31_s19 }
   0xa   :  { %p466_p3 = scmp.ne.s32.totalorder %s31_s19, %s465_s27  ;;  %p471_p5 = scmp.lt.s32.totalorder %s465_s27, %s465_s27 }
   0xc   :  { %p472_p6 = por %p471_p5, %p470_p4 }
   0xe   :  { %p473_p7 = pnand %p472_p6, %p466_p3 }
  0x10   :  { %476 = shalt.err (!%p473_p7)
}
  0x11   :  { %s550_s28 = smov 64   ;;  %s551_s29 = smov 4  }
  0x12   :  { %36 = dma.hbm_to_vmem [thread:$0]  %s662_s1, 1024, %s31_s19, [#allocation6], %s550_s28, %s550_s28, %s551_s29  }
  0x13   :  { %s552_s7 = smov [#allocation2]   ;;  %s477_s11 = scalar_lea.hbm %s661_s0, 384 }
  0x14   :  { %s18_s8 = sshll.u32 %s552_s7, 4  ;;  %p478_p8 = scmp.ne.s32.totalorder %s661_s0, %s477_s11  ;;  %s19_s8 = int_to_ptr.vmem [resolvable:$true] %s18_s8 }
  0x15   :  { %p481_p9 = scmp.lt.u32.totalorder %s477_s11, %s661_s0 }
  0x17   :  { %p483_p10 = pnand %p481_p9, %p478_p8 }
  0x19   :  { %486 = shalt.err (!%p483_p10)
}
  0x1a   :  { %s487_s16 = scalar_lea.vmem %s19_s8, 384  ;;  %p492_p12 = scmp.lt.s32.totalorder %s19_s8, %s19_s8 }
  0x1b   :  { %p488_p11 = scmp.ne.s32.totalorder %s19_s8, %s487_s16  ;;  %p493_p13 = scmp.lt.s32.totalorder %s487_s16, %s487_s16 }
  0x1d   :  { %p494_p0 = por %p493_p13, %p492_p12 }
  0x1f   :  { %p495_p1 = pnand %p494_p0, %p488_p11 }
  0x21   :  { %498 = shalt.err (!%p495_p1)
}
  0x22   :  { %s553_s1 = smov 128   ;;  %s554_s17 = smov 8  }
  0x23   :  { %24 = dma.hbm_to_vmem [thread:$0]  %s661_s0, 384, %s19_s8, [#allocation3], %s553_s1, %s553_s1, %s554_s17  }
  0x24   :  { %s555_s20 = smov [#allocation7]   ;;  %s499_s24 = scalar_lea.hbm %s664_s3, 1024 }
  0x25   :  { %s44_s21 = sshll.u32 %s555_s20, 4  ;;  %p500_p2 = scmp.ne.s32.totalorder %s664_s3, %s499_s24  ;;  %s45_s21 = int_to_ptr.vmem [resolvable:$true] %s44_s21 }
  0x26   :  { %p503_p3 = scmp.lt.u32.totalorder %s499_s24, %s664_s3 }
  0x28   :  { %p505_p4 = pnand %p503_p3, %p500_p2 }
  0x2a   :  { %508 = shalt.err (!%p505_p4)
}
  0x2b   :  { %s509_s6 = scalar_lea.vmem %s45_s21, 1024  ;;  %p514_p6 = scmp.lt.s32.totalorder %s45_s21, %s45_s21 }
  0x2c   :  { %p510_p5 = scmp.ne.s32.totalorder %s45_s21, %s509_s6  ;;  %p515_p7 = scmp.lt.s32.totalorder %s509_s6, %s509_s6 }
  0x2e   :  { %p516_p8 = por %p515_p7, %p514_p6 }
  0x30   :  { %p517_p9 = pnand %p516_p8, %p510_p5 }
  0x32   :  { %520 = shalt.err (!%p517_p9)
}
  0x33   :  { %50 = dma.hbm_to_vmem [thread:$0]  %s664_s3, 1024, %s45_s21, [#allocation6], %s550_s28, %s550_s28, %s551_s29  }
  0x34   :  { %543 = dma.done.wait [#allocation3], 384  }
  0x35   :  { %544 = vsyncadd [#allocation3], 4294966912 }
  0x36   :  { %545 = dma.done.wait [#allocation6], 2048  }
  0x37   :  { %546 = vsyncadd [#allocation6], 4294965248  ;;  %v439_v0 = vld [vmem:[#allocation5] sm:$0xff]   ;;  %v440_v1 = vld [vmem:[#allocation5 + $0x8] sm:$0xff]  }
  0x38   :  { %391 = vmatprep.subr.bf16.mxu0 %v439_v0  ;;  %v441_v2 = vld [vmem:[#allocation5 + $0x10] sm:$0xff]   ;;  %v442_v3 = vld [vmem:[#allocation5 + $0x18] sm:$0xff]   ;;  %v632_v4 = vld [vmem:[#allocation2] sm:$0xff] }
  0x39   :  { %392 = vmatpush3.bf16.msra.mxu0 %v439_v0  ;;  %v634_v5 = vld [vmem:[#allocation2 + $0x8] sm:$0xff]  ;;  %v447_v7 = vld [vmem:[#allocation7] sm:$0xff]   ;;  %v448_v8 = vld [vmem:[#allocation7 + $0x8] sm:$0xff]  }
  0x3a   :  { %393 = vmatprep.subr.bf16.mxu0 %v440_v1  ;;  %v66_v6 = vpack.c.bf16 %v634_v5, %v632_v4  ;;  %v443_v9 = vld [vmem:[#allocation5 + $0x20] sm:$0xff]   ;;  %411 = vmatprep.subr.bf16.mxu1 %v447_v7  ;;  %v449_v10 = vld [vmem:[#allocation7 + $0x10] sm:$0xff]   ;;  %v444_v11 = vld [vmem:[#allocation5 + $0x28] sm:$0xff]  }
  0x3b   :  { %412 = vmatpush3.bf16.msra.mxu1 %v447_v7  ;;  %v450_v12 = vld [vmem:[#allocation7 + $0x18] sm:$0xff]   ;;  %v445_v13 = vld [vmem:[#allocation5 + $0x30] sm:$0xff]   ;;  %v451_v14 = vld [vmem:[#allocation7 + $0x20] sm:$0xff]  }
  0x3c   :  { %407 = vmatprep.mubr.bf16.mxu0 %v66_v6  ;;  %413 = vmatprep.subr.bf16.mxu1 %v448_v8  ;;  %v446_v15 = vld [vmem:[#allocation5 + $0x38] sm:$0xff]   ;;  %v452_v18 = vld [vmem:[#allocation7 + $0x28] sm:$0xff]   ;;  %v453_v19 = vld [vmem:[#allocation7 + $0x30] sm:$0xff]  }
  0x3d   :  { %394 = vmatpush3.bf16.msra.mxu0 %v440_v1  ;;  %v65_v16 = vld [vmem:[#allocation2 + $0x10] sm:$0xff]  ;;  %v353_v21 = vld [vmem:[%s663_s2] ss:$0 sm:$0xff] }
  0x3e   :  { %395 = vmatprep.subr.bf16.mxu0 %v441_v2  ;;  %v67_v17 = vpack.c.bf16 %v65_v16, %v65_v16  ;;  %v454_v20 = vld [vmem:[#allocation7 + $0x38] sm:$0xff]   ;;  %v362_v37 = vld [vmem:[%s665_s4] ss:$0 sm:$0xff]  ;;  %s556_s4 = smov [#allocation8]  }
  0x3f   :  { %414 = vmatpush3.bf16.msra.mxu1 %v448_v8  ;;  %s340_s8 = sshll.u32 %s556_s4, 4  ;;  %s341_s8 = int_to_ptr.vmem [resolvable:$true] %s340_s8 }
  0x40   :  { %415 = vmatprep.subr.bf16.mxu1 %v449_v10  ;;  %s521_s9 = scalar_lea.vmem %s341_s8, 384  ;;  %p526_p11 = scmp.lt.s32.totalorder %s341_s8, %s341_s8 }
  0x41   :  { %396 = vmatpush3.bf16.msra.mxu0 %v441_v2  ;;  %p522_p10 = scmp.ne.s32.totalorder %s341_s8, %s521_s9  ;;  %p527_p12 = scmp.lt.s32.totalorder %s521_s9, %s521_s9 }
  0x42   :  { %397 = vmatprep.subr.bf16.mxu0 %v442_v3 }
  0x43   :  { %416 = vmatpush3.bf16.msra.mxu1 %v449_v10  ;;  %p528_p13 = por %p527_p12, %p526_p11 }
  0x44   :  { %417 = vmatprep.subr.bf16.mxu1 %v450_v12 }
  0x45   :  { %398 = vmatpush3.bf16.msra.mxu0 %v442_v3  ;;  %p529_p0 = pnand %p528_p13, %p522_p10 }
  0x46   :  { %399 = vmatprep.subr.bf16.mxu0 %v443_v9 }
  0x47   :  { %418 = vmatpush3.bf16.msra.mxu1 %v450_v12 }
  0x48   :  { %419 = vmatprep.subr.bf16.mxu1 %v451_v14 }
  0x49   :  { %400 = vmatpush3.bf16.msra.mxu0 %v443_v9 }
  0x4a   :  { %401 = vmatprep.subr.bf16.mxu0 %v444_v11 }
  0x4b   :  { %420 = vmatpush3.bf16.msra.mxu1 %v451_v14 }
  0x4c   :  { %421 = vmatprep.subr.bf16.mxu1 %v452_v18 }
  0x4d   :  { %402 = vmatpush3.bf16.msra.mxu0 %v444_v11 }
  0x4e   :  { %403 = vmatprep.subr.bf16.mxu0 %v445_v13 }
  0x4f   :  { %422 = vmatpush3.bf16.msra.mxu1 %v452_v18 }
  0x50   :  { %423 = vmatprep.subr.bf16.mxu1 %v453_v19 }
  0x51   :  { %404 = vmatpush3.bf16.msra.mxu0 %v445_v13 }
  0x52   :  { %405 = vmatprep.subr.bf16.mxu0 %v446_v15 }
  0x53   :  { %424 = vmatpush3.bf16.msra.mxu1 %v453_v19 }
  0x54   :  { %425 = vmatprep.subr.bf16.mxu1 %v454_v20 }
  0x55   :  { %406 = vmatpush3.bf16.msra.mxu0 %v446_v15 }
  0x57   :  { %426 = vmatpush3.bf16.msra.mxu1 %v454_v20 }
  0x58   :  { %408 = vmatmul.mubr.bf16.vlgmr.msra.gmra.mrb[0].mxu0 %v67_v17 }
 0x12b   :  { %v409_v22 = vpop.f32.mrb[0].mxu0 }
 0x12c   :  { %v182_v23 = vadd.f32 %v409_v22, %v353_v21  ;;  %v173_v24 = vpop.f32.mrb[1].mxu0 }
 0x12d   :  { %v174_v25 = vadd.f32 %v353_v21, %v173_v24  ;;  %v410_v26 = vpop.f32.mrb[2].mxu0 }
 0x12e   :  { %v192_v27 = vmul.f32 0.2, %v182_v23  ;;  %v176_v28 = vpop.f32.mrb[3].mxu0  ;;  %vm189_vm0 = vcmp.ge.f32.partialorder %v182_v23, 0.0 }
 0x12f   :  { %v190_v29 = vmul.f32 0.2, %v174_v25  ;;  %v177_v30 = vadd.f32 %v353_v21, %v176_v28  ;;  %vm187_vm1 = vcmp.ge.f32.partialorder %v174_v25, 0.0 }
 0x130   :  { %v195_v32 = vsel %vm189_vm0, %v182_v23, %v192_v27 }
 0x131   :  { %v191_v31 = vmul.f32 0.2, %v177_v30  ;;  %vm188_vm2 = vcmp.ge.f32.partialorder %v177_v30, 0.0  ;;  %v193_v33 = vsel %vm187_vm1, %v174_v25, %v190_v29  ;;  %v197_v36 = vpack.c.bf16 %v195_v32, %v195_v32 }
 0x133   :  { %v194_v34 = vsel %vm188_vm2, %v177_v30, %v191_v31 }
 0x134   :  { %v196_v35 = vpack.c.bf16 %v194_v34, %v193_v33 }
 0x136   :  { %427 = vmatprep.mubr.bf16.mxu1 %v196_v35 }
 0x137   :  { %428 = vmatmul.mubr.bf16.vlgmr.msra.gmra.mrb[0].mxu1 %v197_v36 }
 0x20a   :  { %v429_v38 = vpop.f32.mrb[0].mxu1 }
 0x20b   :  { %v312_v39 = vadd.f32 %v429_v38, %v362_v37  ;;  %v303_v40 = vpop.f32.mrb[1].mxu1 }
 0x20c   :  { %v304_v41 = vadd.f32 %v362_v37, %v303_v40  ;;  %v430_v42 = vpop.f32.mrb[2].mxu1 }
 0x20d   :  { %vm319_vm3 = vcmp.ge.f32.partialorder %v312_v39, 0.0  ;;  %v322_v43 = vmul.f32 0.2, %v312_v39  ;;  %v306_v44 = vpop.f32.mrb[3].mxu1 }
 0x20e   :  { %vm317_vm4 = vcmp.ge.f32.partialorder %v304_v41, 0.0  ;;  %v320_v45 = vmul.f32 0.2, %v304_v41  ;;  %v307_v46 = vadd.f32 %v362_v37, %v306_v44 }
 0x20f   :  { %v325_v47 = vsel %vm319_vm3, %v312_v39, %v322_v43 }
 0x210   :  { %v328_v48 = vmul.f32 1.4142135, %v325_v47  ;;  %v323_v49 = vsel %vm317_vm4, %v304_v41, %v320_v45  ;;  %vm318_vm5 = vcmp.ge.f32.partialorder %v307_v46, 0.0  ;;  %v321_v50 = vmul.f32 0.2, %v307_v46 }
 0x211   :  { %v326_v51 = vmul.f32 1.4142135, %v323_v49 }
 0x212   :  { %v331_v52 = vadd.f32 %v328_v48, %v65_v16  ;;  %v324_v53 = vsel %vm318_vm5, %v307_v46, %v321_v50 }
 0x213   :  { %v329_v54 = vadd.f32 %v326_v51, %v632_v4  ;;  %v327_v55 = vmul.f32 1.4142135, %v324_v53 }
 0x214   :  { %334 = vst [vmem:[#allocation8 + $0x10] sm:$0xff] %v331_v52 }
 0x215   :  { %332 = vst [vmem:[#allocation8] sm:$0xff] %v329_v54  ;;  %v330_v56 = vadd.f32 %v327_v55, %v634_v5 }
 0x217   :  { %333 = vst [vmem:[#allocation8 + $0x8] sm:$0xff] %v330_v56 }
 0x218   :  { %532 = shalt.err (!%p529_p0)
}
 0x219   :  { %s533_s12 = scalar_lea.hbm %s666_s5, 384 }
 0x21a   :  { %p534_p1 = scmp.ne.s32.totalorder %s666_s5, %s533_s12  ;;  %p537_p2 = scmp.lt.u32.totalorder %s533_s12, %s666_s5 }
 0x21c   :  { %p539_p3 = pnand %p537_p2, %p534_p1 }
 0x21e   :  { %542 = shalt.err (!%p539_p3)
}
 0x21f   :  { %346 = dma.vmem_to_hbm [thread:$0]  %s341_s8, 384, %s666_s5, [#allocation4], %s553_s1, %s553_s1, %s554_s17  }
 0x220   :  { %547 = dma.done.wait [#allocation4], 384  }
 0x221   :  { %548 = vsyncadd [#allocation4], 4294966912 }
 0x222   :  { %350 = vsyncpa [#allocation3], 1 }
 0x223   :  { %351 = vsyncpa [#allocation6], 1 }
 0x224   :  { %352 = vsyncpa [#allocation4], 1 }

</bundles_post_ra>
